<compile_context>
chip_gen: v7x
topology: tpu7x:2x2x1
jax: 0.10.0
libtpu: 0.0.40
codegen_flags: <defaults>
</compile_context>

<pallas_src>
import functools

import jax
import jax.numpy as jnp
import numpy as np
from jax.experimental import pallas as pl
from jax.experimental.pallas import tpu as pltpu


def _round_up(x, m):
    return ((x + m - 1) // m) * m


def _sigmoid(x):
    return 1.0 / (1.0 + jnp.exp(-x))


def yolo_loss_kernel(slab_ref, out_ref,
                     obj_acc_ref, objcnt_ref, noobj_acc_ref, noobjcnt_ref,
                     *, n_valid):
    """One (f_total, tnsub, 128) block; accumulates masked partial sums.

    Slab rows: [0]=p_obj, [1:3]=p_xy, [3:5]=p_wh + log(anchor), [5:F]=class logits,
               [F]=t_obj, [F+1:F+3]=t_xy, [F+3:F+5]=t_wh, [F+5]=t_cls,
               with F = 5 + num_classes and f_total = F + 6.
    Cell n lives at (nb, lane) = (n // 128, n % 128) of dims 1 and 2.
    """
    t = pl.program_id(1)
    f_total, tnsub, _ = slab_ref.shape
    F = f_total - 6
    C = F - 5

    @pl.when(t == 0)
    def _init():
        obj_acc_ref[...] = jnp.zeros_like(obj_acc_ref)
        objcnt_ref[...] = jnp.zeros_like(objcnt_ref)
        noobj_acc_ref[...] = jnp.zeros_like(noobj_acc_ref)
        noobjcnt_ref[...] = jnp.zeros_like(noobjcnt_ref)

    p0 = slab_ref[0:1, :, :]                 # (1, tnsub, 128) objectness logit
    pxy = slab_ref[1:3, :, :]                # (2, tnsub, 128)
    pwh_raw = slab_ref[3:5, :, :]            # (2, tnsub, 128)  (includes +log anchor)
    logits = slab_ref[5:F, :, :]             # (C, tnsub, 128)
    t0 = slab_ref[F:F + 1, :, :]             # (1, tnsub, 128) target objectness
    txy = slab_ref[F + 1:F + 3, :, :]        # (2, tnsub, 128)
    twh = slab_ref[F + 3:F + 5, :, :]        # (2, tnsub, 128)
    tcls = slab_ref[F + 5:F + 6, :, :]       # (1, tnsub, 128)

    # ---- validity mask for the ragged tail (partial boundary blocks) ----
    cb0 = (pl.program_id(0) * pl.num_programs(1) + pl.program_id(1)) * tnsub
    sb = jax.lax.broadcasted_iota(jnp.int32, (1, tnsub, 128), 1)
    ln = jax.lax.broadcasted_iota(jnp.int32, (1, tnsub, 128), 2)
    n_idx = (cb0 + sb) * 128 + ln
    valid = n_idx < n_valid

    obj = jnp.logical_and(t0 == 1.0, valid)
    noobj = jnp.logical_and(t0 == 0.0, valid)

    # ---- no-object loss: BCE-with-logits (stable form), masked by noobj ----
    bce = (jnp.maximum(p0, 0.0) - p0 * t0
           + jnp.log(1.0 + jnp.exp(-jnp.abs(p0))))

    # ---- decoded boxes + IoU (midpoint format) ----
    sxy = _sigmoid(pxy)
    pwh = jnp.exp(pwh_raw)                   # == exp(raw wh) * anchor
    b1_lo = sxy - 0.5 * pwh
    b1_hi = sxy + 0.5 * pwh
    b2_lo = txy - 0.5 * twh
    b2_hi = txy + 0.5 * twh
    ext = jnp.maximum(jnp.minimum(b1_hi, b2_hi) - jnp.maximum(b1_lo, b2_lo), 0.0)
    inter = ext[0:1, :, :] * ext[1:2, :, :]
    area1 = jnp.abs(pwh[0:1, :, :] * pwh[1:2, :, :])
    area2 = jnp.abs(twh[0:1, :, :] * twh[1:2, :, :])
    iou = inter / (area1 + area2 - inter + 1e-6)

    # ---- object loss: MSE(sigmoid(p0), iou * t0), masked by obj ----
    obj_se = (_sigmoid(p0) - iou * t0) ** 2

    # ---- box loss: MSE([sig(xy), raw wh] vs [t_xy, log(t_wh/anchor)]) ----
    # raw_wh - log(t_wh/anchor) == (raw_wh + log anchor) - log(t_wh)   (anchor folded)
    dxy = sxy - txy
    dwh = pwh_raw - jnp.log(twh + 1e-16)
    box_se = (dxy[0:1, :, :] * dxy[0:1, :, :] + dxy[1:2, :, :] * dxy[1:2, :, :]
              + dwh[0:1, :, :] * dwh[0:1, :, :] + dwh[1:2, :, :] * dwh[1:2, :, :])

    # ---- class loss: softmax cross-entropy (static unrolled over C classes) ----
    m = logits[0:1, :, :]
    for c in range(1, C):
        m = jnp.maximum(m, logits[c:c + 1, :, :])
    sumexp = jnp.exp(logits[0:1, :, :] - m)
    for c in range(1, C):
        sumexp = sumexp + jnp.exp(logits[c:c + 1, :, :] - m)
    lse = m + jnp.log(sumexp)
    picked = jnp.where(tcls == 0.0, logits[0:1, :, :], 0.0)
    for c in range(1, C):
        picked = picked + jnp.where(tcls == float(c), logits[c:c + 1, :, :], 0.0)
    ce = lse - picked

    # Fold loss weights: lambda_box/4 = 2.5, lambda_obj = lambda_class = 1.
    combined = 2.5 * box_se + obj_se + ce
    obj_acc_ref[...] += jnp.where(obj, combined, 0.0)
    objcnt_ref[...] += obj.astype(jnp.float32)
    noobj_acc_ref[...] += jnp.where(noobj, bce, 0.0)
    noobjcnt_ref[...] += noobj.astype(jnp.float32)

    # ---- finalize this partition: 4 raw partial sums packed into lanes 0..3 ----
    @pl.when(t == pl.num_programs(1) - 1)
    def _finish():
        obj_tot = jnp.sum(obj_acc_ref[...])
        n_obj = jnp.sum(objcnt_ref[...])
        noobj_tot = jnp.sum(noobj_acc_ref[...])
        n_noobj = jnp.sum(noobjcnt_ref[...])
        lane = jax.lax.broadcasted_iota(jnp.int32, (1, 128), 1)
        out_ref[...] = (jnp.where(lane == 0, obj_tot, 0.0)
                        + jnp.where(lane == 1, n_obj, 0.0)
                        + jnp.where(lane == 2, noobj_tot, 0.0)
                        + jnp.where(lane == 3, n_noobj, 0.0))


@functools.partial(jax.jit, static_argnames=("tile_n", "num_partitions"))
def yolo_loss_pallas(predictions, target, anchors, tile_n=8192, num_partitions=1):
    """num_partitions: 1 for v5e/v6e (single TensorCore), 2 for v7x (2 TCs/chip)."""
    B, A, S1, S2, F = predictions.shape
    N = B * A * S1 * S2
    f_total = F + 6

    # One relayout pass: fold log(anchor) into the wh logits so no per-cell anchor
    # rows are materialized, then fuse pred+target into a feature-major 3-D slab.
    pred = predictions.astype(jnp.float32)
    targ = target.astype(jnp.float32)
    log_anc = jnp.log(anchors.astype(jnp.float32)).reshape(1, A, 1, 1, 2)
    fused = jnp.concatenate(
        [pred[..., 0:3], pred[..., 3:5] + log_anc, pred[..., 5:], targ],
        axis=-1)                                   # (B, A, S1, S2, F+6)
    flat = fused.reshape(N, f_total)

    N128 = _round_up(N, 128)
    if N128 != N:
        # TODO(synk): residual <=127-column pad only when N isn't 128-aligned; the
        # tile-multiple padding of the old version is gone (handled by in-kernel mask).
        flat = jnp.pad(flat, ((0, N128 - N), (0, 0)))
    NB = N128 // 128
    slab = flat.reshape(NB, 128, f_total).transpose(2, 0, 1)   # (f_total, NB, 128)

    # Partition / tile sizing (block dims: multiples of 8 sublane-blocks).
    P = max(1, min(int(num_partitions), max(NB // 8, 1)))
    per_part = -(-NB // P)
    tnsub = max(8, min(int(tile_n) // 128, _round_up(per_part, 8)))
    tnsub = _round_up(tnsub, 8)
    T = -(-per_part // tnsub)

    kernel = functools.partial(yolo_loss_kernel, n_valid=N)

    partials = pl.pallas_call(
        kernel,
        out_shape=jax.ShapeDtypeStruct((1, P * 128), jnp.float32),
        grid_spec=pltpu.PrefetchScalarGridSpec(
            num_scalar_prefetch=0,
            grid=(P, T),
            in_specs=[pl.BlockSpec((f_total, tnsub, 128),
                                   lambda p, t: (0, p * T + t, 0))],
            out_specs=pl.BlockSpec((1, 128), lambda p, t: (0, p)),
            scratch_shapes=[pltpu.VMEM((1, tnsub, 128), jnp.float32)] * 4),
        compiler_params=pltpu.CompilerParams(
            dimension_semantics=("parallel", "arbitrary")),
    )(slab)

    parts = partials.reshape(P, 128)
    obj_tot = jnp.sum(parts[:, 0])      # 2.5*box_se + obj_se + ce, obj-masked
    n_obj = jnp.sum(parts[:, 1])
    noobj_tot = jnp.sum(parts[:, 2])
    n_noobj = jnp.sum(parts[:, 3])
    # 10*box_sum/(4 n_obj) + obj_sum/n_obj + cls_sum/n_obj == obj_tot / n_obj
    return obj_tot / n_obj + 10.0 * noobj_tot / n_noobj


def yolo_loss_ref(pred, targ, anchors):
    """Pure-JAX reference mirroring the PyTorch forward."""
    pred = pred.astype(jnp.float32)
    targ = targ.astype(jnp.float32)
    A = pred.shape[1]
    t0 = targ[..., 0:1]
    obj = t0 == 1.0
    noobj = t0 == 0.0
    p0 = pred[..., 0:1]

    bce = jnp.maximum(p0, 0.0) - p0 * t0 + jnp.log1p(jnp.exp(-jnp.abs(p0)))
    no_object_loss = jnp.sum(jnp.where(noobj, bce, 0.0)) / jnp.sum(noobj)

    a = anchors.reshape(1, A, 1, 1, 2).astype(jnp.float32)
    sxy = jax.nn.sigmoid(pred[..., 1:3])
    pwh = jnp.exp(pred[..., 3:5]) * a
    b1x1, b1y1 = sxy[..., 0:1] - pwh[..., 0:1] / 2, sxy[..., 1:2] - pwh[..., 1:2] / 2
    b1x2, b1y2 = sxy[..., 0:1] + pwh[..., 0:1] / 2, sxy[..., 1:2] + pwh[..., 1:2] / 2
    txy, twh = targ[..., 1:3], targ[..., 3:5]
    b2x1, b2y1 = txy[..., 0:1] - twh[..., 0:1] / 2, txy[..., 1:2] - twh[..., 1:2] / 2
    b2x2, b2y2 = txy[..., 0:1] + twh[..., 0:1] / 2, txy[..., 1:2] + twh[..., 1:2] / 2
    inter = (jnp.maximum(jnp.minimum(b1x2, b2x2) - jnp.maximum(b1x1, b2x1), 0.0) *
             jnp.maximum(jnp.minimum(b1y2, b2y2) - jnp.maximum(b1y1, b2y1), 0.0))
    area1 = jnp.abs((b1x2 - b1x1) * (b1y2 - b1y1))
    area2 = jnp.abs((b2x2 - b2x1) * (b2y2 - b2y1))
    iou = inter / (area1 + area2 - inter + 1e-6)

    object_loss = (jnp.sum(jnp.where(obj, (jax.nn.sigmoid(p0) - iou * t0) ** 2, 0.0))
                   / jnp.sum(obj))

    twh_log = jnp.log(1e-16 + targ[..., 3:5] / a)
    box_se = jnp.sum((sxy - targ[..., 1:3]) ** 2 + (pred[..., 3:5] - twh_log) ** 2,
                     axis=-1, keepdims=True)
    box_loss = jnp.sum(jnp.where(obj, box_se, 0.0)) / (4.0 * jnp.sum(obj))

    logits = pred[..., 5:]
    lse = jax.nn.logsumexp(logits, axis=-1, keepdims=True)
    label = targ[..., 5:6].astype(jnp.int32)
    iota = jax.lax.broadcasted_iota(jnp.int32, logits.shape, logits.ndim - 1)
    picked = jnp.sum(jnp.where(iota == label, logits, 0.0), axis=-1, keepdims=True)
    class_loss = jnp.sum(jnp.where(obj, lse - picked, 0.0)) / jnp.sum(obj)

    return (10.0 * box_loss + 1.0 * object_loss
            + 10.0 * no_object_loss + 1.0 * class_loss)


if __name__ == "__main__":
    key = jax.random.PRNGKey(0)
    k1, k2, k3, k4, k5, k6 = jax.random.split(key, 6)

    B, A, S, C = 2, 3, 8, 4          # small YOLO head: (B, 3, S, S, 5+C)
    predictions = jax.random.normal(k1, (B, A, S, S, 5 + C), jnp.float32)

    obj_mask = jax.random.uniform(k2, (B, A, S, S)) < 0.2
    ign_mask = (jax.random.uniform(k3, (B, A, S, S)) < 0.05) & (~obj_mask)
    t0 = jnp.where(obj_mask, 1.0, 0.0)
    t0 = jnp.where(ign_mask, -1.0, t0)
    xy = jax.random.uniform(k4, (B, A, S, S, 2), minval=0.05, maxval=0.95)
    wh = jax.random.uniform(k5, (B, A, S, S, 2), minval=0.5, maxval=3.0)
    cls = jax.random.randint(k6, (B, A, S, S), 0, C).astype(jnp.float32)
    target = jnp.concatenate([t0[..., None], xy, wh, cls[..., None]], axis=-1)

    anchors = jnp.array([[0.28, 0.22], [0.38, 0.48], [0.90, 0.78]], jnp.float32)

    loss = yolo_loss_pallas(predictions, target, anchors)
    loss = jax.block_until_ready(loss)

    ref = yolo_loss_ref(predictions, target, anchors)
    np.testing.assert_allclose(np.asarray(loss), np.asarray(ref),
                               rtol=1e-2, atol=1e-2)

    print("KERNEL_OK")
</pallas_src>

<mosaic_0001>
module attributes {stable_mosaic.version = 11 : i64} {
  func.func @yolo_loss_kernel(%arg0: i32, %arg1: i32, %arg2: memref<15x8x128xf32, #tpu.memory_space<vmem>>, %arg3: memref<1x128xf32, #tpu.memory_space<vmem>>, %arg4: memref<1x8x128xf32, #tpu.memory_space<vmem>>, %arg5: memref<1x8x128xf32, #tpu.memory_space<vmem>>, %arg6: memref<1x8x128xf32, #tpu.memory_space<vmem>>, %arg7: memref<1x8x128xf32, #tpu.memory_space<vmem>>) attributes {dimension_semantics = [#tpu.dimension_semantics<parallel>, #tpu.dimension_semantics<arbitrary>], iteration_bounds = array<i64: 1, 1>, scalar_prefetch = 0 : i64, scratch_operands = 4 : i64, tpu.core_type = #tpu.core_type<tc>, window_params = [{transform_indices = @transform_0, window_bounds = array<i64: 15, 8, 128>}, {transform_indices = @transform_1, window_bounds = array<i64: 1, 128>}]} {
    %c0_i32 = arith.constant 0 : i32
    %0 = arith.cmpi eq, %arg1, %c0_i32 : i32
    %1 = arith.extui %0 : i1 to i32
    %c0_i32_0 = arith.constant 0 : i32
    %2 = arith.cmpi ne, %1, %c0_i32_0 : i32
    scf.if %2 {
      %cst_71 = arith.constant 0.000000e+00 : f32
      %187 = vector.broadcast %cst_71 : f32 to vector<1x8x128xf32>
      %c0_72 = arith.constant 0 : index
      %c0_73 = arith.constant 0 : index
      %c0_74 = arith.constant 0 : index
      %188 = vector.load %arg4[%c0_72, %c0_73, %c0_74] : memref<1x8x128xf32, #tpu.memory_space<vmem>>, vector<1x8x128xf32>
      tpu.vector_store %arg4[%c0_72, %c0_73, %c0_74], %187 {strides = array<i32>} : memref<1x8x128xf32, #tpu.memory_space<vmem>>, vector<1x8x128xf32>,
      %cst_75 = arith.constant 0.000000e+00 : f32
      %189 = vector.broadcast %cst_75 : f32 to vector<1x8x128xf32>
      %c0_76 = arith.constant 0 : index
      %c0_77 = arith.constant 0 : index
      %c0_78 = arith.constant 0 : index
      %190 = vector.load %arg5[%c0_76, %c0_77, %c0_78] : memref<1x8x128xf32, #tpu.memory_space<vmem>>, vector<1x8x128xf32>
      tpu.vector_store %arg5[%c0_76, %c0_77, %c0_78], %189 {strides = array<i32>} : memref<1x8x128xf32, #tpu.memory_space<vmem>>, vector<1x8x128xf32>,
      %cst_79 = arith.constant 0.000000e+00 : f32
      %191 = vector.broadcast %cst_79 : f32 to vector<1x8x128xf32>
      %c0_80 = arith.constant 0 : index
      %c0_81 = arith.constant 0 : index
      %c0_82 = arith.constant 0 : index
      %192 = vector.load %arg6[%c0_80, %c0_81, %c0_82] : memref<1x8x128xf32, #tpu.memory_space<vmem>>, vector<1x8x128xf32>
      tpu.vector_store %arg6[%c0_80, %c0_81, %c0_82], %191 {strides = array<i32>} : memref<1x8x128xf32, #tpu.memory_space<vmem>>, vector<1x8x128xf32>,
      %cst_83 = arith.constant 0.000000e+00 : f32
      %193 = vector.broadcast %cst_83 : f32 to vector<1x8x128xf32>
      %c0_84 = arith.constant 0 : index
      %c0_85 = arith.constant 0 : index
      %c0_86 = arith.constant 0 : index
      %194 = vector.load %arg7[%c0_84, %c0_85, %c0_86] : memref<1x8x128xf32, #tpu.memory_space<vmem>>, vector<1x8x128xf32>
      tpu.vector_store %arg7[%c0_84, %c0_85, %c0_86], %193 {strides = array<i32>} : memref<1x8x128xf32, #tpu.memory_space<vmem>>, vector<1x8x128xf32>,
    } else {
    }
    %c0 = arith.constant 0 : index
    %c0_1 = arith.constant 0 : index
    %c0_2 = arith.constant 0 : index
    %3 = vector.load %arg2[%c0, %c0_1, %c0_2] : memref<15x8x128xf32, #tpu.memory_space<vmem>>, vector<1x8x128xf32>
    %c1 = arith.constant 1 : index
    %c0_3 = arith.constant 0 : index
    %c0_4 = arith.constant 0 : index
    %4 = vector.load %arg2[%c1, %c0_3, %c0_4] : memref<15x8x128xf32, #tpu.memory_space<vmem>>, vector<2x8x128xf32>
    %c3 = arith.constant 3 : index
    %c0_5 = arith.constant 0 : index
    %c0_6 = arith.constant 0 : index
    %5 = vector.load %arg2[%c3, %c0_5, %c0_6] : memref<15x8x128xf32, #tpu.memory_space<vmem>>, vector<2x8x128xf32>
    %c5 = arith.constant 5 : index
    %c0_7 = arith.constant 0 : index
    %c0_8 = arith.constant 0 : index
    %6 = vector.load %arg2[%c5, %c0_7, %c0_8] : memref<15x8x128xf32, #tpu.memory_space<vmem>>, vector<4x8x128xf32>
    %c9 = arith.constant 9 : index
    %c0_9 = arith.constant 0 : index
    %c0_10 = arith.constant 0 : index
    %7 = vector.load %arg2[%c9, %c0_9, %c0_10] : memref<15x8x128xf32, #tpu.memory_space<vmem>>, vector<1x8x128xf32>
    %c10 = arith.constant 10 : index
    %c0_11 = arith.constant 0 : index
    %c0_12 = arith.constant 0 : index
    %8 = vector.load %arg2[%c10, %c0_11, %c0_12] : memref<15x8x128xf32, #tpu.memory_space<vmem>>, vector<2x8x128xf32>
    %c12 = arith.constant 12 : index
    %c0_13 = arith.constant 0 : index
    %c0_14 = arith.constant 0 : index
    %9 = vector.load %arg2[%c12, %c0_13, %c0_14] : memref<15x8x128xf32, #tpu.memory_space<vmem>>, vector<2x8x128xf32>
    %c14 = arith.constant 14 : index
    %c0_15 = arith.constant 0 : index
    %c0_16 = arith.constant 0 : index
    %10 = vector.load %arg2[%c14, %c0_15, %c0_16] : memref<15x8x128xf32, #tpu.memory_space<vmem>>, vector<1x8x128xf32>
    %c1_i32 = arith.constant 1 : i32
    %11 = arith.muli %arg0, %c1_i32 : i32
    %12 = arith.addi %11, %arg1 : i32
    %c8_i32 = arith.constant 8 : i32
    %13 = arith.muli %12, %c8_i32 : i32
    %14 = tpu.iota {dimensions = array<i32: 1>} : vector<1x8x128xi32>
    %15 = tpu.iota {dimensions = array<i32: 2>} : vector<1x8x128xi32>
    %16 = vector.broadcast %13 : i32 to vector<1x8x128xi32>
    %17 = arith.addi %16, %14 : vector<1x8x128xi32>
    %c128_i32 = arith.constant 128 : i32
    %18 = vector.broadcast %c128_i32 : i32 to vector<1x8x128xi32>
    %19 = arith.muli %17, %18 : vector<1x8x128xi32>
    %20 = arith.addi %19, %15 : vector<1x8x128xi32>
    %c384_i32 = arith.constant 384 : i32
    %21 = vector.broadcast %c384_i32 : i32 to vector<1x8x128xi32>
    %22 = arith.cmpi slt, %20, %21 : vector<1x8x128xi32>
    %cst = arith.constant 1.000000e+00 : f32
    %23 = vector.broadcast %cst : f32 to vector<1x8x128xf32>
    %24 = arith.cmpf oeq, %7, %23 : vector<1x8x128xf32>
    %25 = arith.andi %24, %22 : vector<1x8x128xi1>
    %cst_17 = arith.constant 0.000000e+00 : f32
    %26 = vector.broadcast %cst_17 : f32 to vector<1x8x128xf32>
    %27 = arith.cmpf oeq, %7, %26 : vector<1x8x128xf32>
    %28 = arith.andi %27, %22 : vector<1x8x128xi1>
    %cst_18 = arith.constant 0.000000e+00 : f32
    %29 = vector.broadcast %cst_18 : f32 to vector<1x8x128xf32>
    %30 = arith.maximumf %3, %29 : vector<1x8x128xf32>
    %31 = arith.mulf %3, %7 : vector<1x8x128xf32>
    %32 = arith.subf %30, %31 : vector<1x8x128xf32>
    %33 = math.absf %3 : vector<1x8x128xf32>
    %cst_19 = arith.constant 0.000000e+00 : f32
    %34 = vector.broadcast %cst_19 : f32 to vector<1x8x128xf32>
    %35 = arith.subf %34, %33 : vector<1x8x128xf32>
    %36 = math.exp %35 : vector<1x8x128xf32>
    %cst_20 = arith.constant 1.000000e+00 : f32
    %37 = vector.broadcast %cst_20 : f32 to vector<1x8x128xf32>
    %38 = arith.addf %37, %36 : vector<1x8x128xf32>
    %39 = math.log %38 : vector<1x8x128xf32>
    %40 = arith.addf %32, %39 : vector<1x8x128xf32>
    %cst_21 = arith.constant 0.000000e+00 : f32
    %41 = vector.broadcast %cst_21 : f32 to vector<2x8x128xf32>
    %42 = arith.subf %41, %4 : vector<2x8x128xf32>
    %43 = math.exp %42 : vector<2x8x128xf32>
    %cst_22 = arith.constant 1.000000e+00 : f32
    %44 = vector.broadcast %cst_22 : f32 to vector<2x8x128xf32>
    %45 = arith.addf %44, %43 : vector<2x8x128xf32>
    %cst_23 = arith.constant 1.000000e+00 : f32
    %46 = vector.broadcast %cst_23 : f32 to vector<2x8x128xf32>
    %47 = arith.divf %46, %45 : vector<2x8x128xf32>
    %48 = math.exp %5 : vector<2x8x128xf32>
    %cst_24 = arith.constant 5.000000e-01 : f32
    %49 = vector.broadcast %cst_24 : f32 to vector<2x8x128xf32>
    %50 = arith.mulf %49, %48 : vector<2x8x128xf32>
    %51 = arith.subf %47, %50 : vector<2x8x128xf32>
    %cst_25 = arith.constant 5.000000e-01 : f32
    %52 = vector.broadcast %cst_25 : f32 to vector<2x8x128xf32>
    %53 = arith.mulf %52, %48 : vector<2x8x128xf32>
    %54 = arith.addf %47, %53 : vector<2x8x128xf32>
    %cst_26 = arith.constant 5.000000e-01 : f32
    %55 = vector.broadcast %cst_26 : f32 to vector<2x8x128xf32>
    %56 = arith.mulf %55, %9 : vector<2x8x128xf32>
    %57 = arith.subf %8, %56 : vector<2x8x128xf32>
    %cst_27 = arith.constant 5.000000e-01 : f32
    %58 = vector.broadcast %cst_27 : f32 to vector<2x8x128xf32>
    %59 = arith.mulf %58, %9 : vector<2x8x128xf32>
    %60 = arith.addf %8, %59 : vector<2x8x128xf32>
    %61 = arith.minimumf %54, %60 : vector<2x8x128xf32>
    %62 = arith.maximumf %51, %57 : vector<2x8x128xf32>
    %63 = arith.subf %61, %62 : vector<2x8x128xf32>
    %cst_28 = arith.constant 0.000000e+00 : f32
    %64 = vector.broadcast %cst_28 : f32 to vector<2x8x128xf32>
    %65 = arith.maximumf %63, %64 : vector<2x8x128xf32>
    %66 = vector.extract_strided_slice %65 {offsets = [0, 0, 0], sizes = [1, 8, 128], strides = [1, 1, 1]} : vector<2x8x128xf32> to vector<1x8x128xf32>
    %67 = vector.extract_strided_slice %65 {offsets = [1, 0, 0], sizes = [1, 8, 128], strides = [1, 1, 1]} : vector<2x8x128xf32> to vector<1x8x128xf32>
    %68 = arith.mulf %66, %67 : vector<1x8x128xf32>
    %69 = vector.extract_strided_slice %48 {offsets = [0, 0, 0], sizes = [1, 8, 128], strides = [1, 1, 1]} : vector<2x8x128xf32> to vector<1x8x128xf32>
    %70 = vector.extract_strided_slice %48 {offsets = [1, 0, 0], sizes = [1, 8, 128], strides = [1, 1, 1]} : vector<2x8x128xf32> to vector<1x8x128xf32>
    %71 = arith.mulf %69, %70 : vector<1x8x128xf32>
    %72 = math.absf %71 : vector<1x8x128xf32>
    %73 = vector.extract_strided_slice %9 {offsets = [0, 0, 0], sizes = [1, 8, 128], strides = [1, 1, 1]} : vector<2x8x128xf32> to vector<1x8x128xf32>
    %74 = vector.extract_strided_slice %9 {offsets = [1, 0, 0], sizes = [1, 8, 128], strides = [1, 1, 1]} : vector<2x8x128xf32> to vector<1x8x128xf32>
    %75 = arith.mulf %73, %74 : vector<1x8x128xf32>
    %76 = math.absf %75 : vector<1x8x128xf32>
    %77 = arith.addf %72, %76 : vector<1x8x128xf32>
    %78 = arith.subf %77, %68 : vector<1x8x128xf32>
    %cst_29 = arith.constant 9.99999997E-7 : f32
    %79 = vector.broadcast %cst_29 : f32 to vector<1x8x128xf32>
    %80 = arith.addf %78, %79 : vector<1x8x128xf32>
    %81 = arith.divf %68, %80 : vector<1x8x128xf32>
    %cst_30 = arith.constant 0.000000e+00 : f32
    %82 = vector.broadcast %cst_30 : f32 to vector<1x8x128xf32>
    %83 = arith.subf %82, %3 : vector<1x8x128xf32>
    %84 = math.exp %83 : vector<1x8x128xf32>
    %cst_31 = arith.constant 1.000000e+00 : f32
    %85 = vector.broadcast %cst_31 : f32 to vector<1x8x128xf32>
    %86 = arith.addf %85, %84 : vector<1x8x128xf32>
    %cst_32 = arith.constant 1.000000e+00 : f32
    %87 = vector.broadcast %cst_32 : f32 to vector<1x8x128xf32>
    %88 = arith.divf %87, %86 : vector<1x8x128xf32>
    %89 = arith.mulf %81, %7 : vector<1x8x128xf32>
    %90 = arith.subf %88, %89 : vector<1x8x128xf32>
    %91 = arith.mulf %90, %90 : vector<1x8x128xf32>
    %92 = arith.subf %47, %8 : vector<2x8x128xf32>
    %cst_33 = arith.constant 1.000000e-16 : f32
    %93 = vector.broadcast %cst_33 : f32 to vector<2x8x128xf32>
    %94 = arith.addf %9, %93 : vector<2x8x128xf32>
    %95 = math.log %94 : vector<2x8x128xf32>
    %96 = arith.subf %5, %95 : vector<2x8x128xf32>
    %97 = vector.extract_strided_slice %92 {offsets = [0, 0, 0], sizes = [1, 8, 128], strides = [1, 1, 1]} : vector<2x8x128xf32> to vector<1x8x128xf32>
    %98 = vector.extract_strided_slice %92 {offsets = [0, 0, 0], sizes = [1, 8, 128], strides = [1, 1, 1]} : vector<2x8x128xf32> to vector<1x8x128xf32>
    %99 = arith.mulf %97, %98 : vector<1x8x128xf32>
    %100 = vector.extract_strided_slice %92 {offsets = [1, 0, 0], sizes = [1, 8, 128], strides = [1, 1, 1]} : vector<2x8x128xf32> to vector<1x8x128xf32>
    %101 = vector.extract_strided_slice %92 {offsets = [1, 0, 0], sizes = [1, 8, 128], strides = [1, 1, 1]} : vector<2x8x128xf32> to vector<1x8x128xf32>
    %102 = arith.mulf %100, %101 : vector<1x8x128xf32>
    %103 = arith.addf %99, %102 : vector<1x8x128xf32>
    %104 = vector.extract_strided_slice %96 {offsets = [0, 0, 0], sizes = [1, 8, 128], strides = [1, 1, 1]} : vector<2x8x128xf32> to vector<1x8x128xf32>
    %105 = vector.extract_strided_slice %96 {offsets = [0, 0, 0], sizes = [1, 8, 128], strides = [1, 1, 1]} : vector<2x8x128xf32> to vector<1x8x128xf32>
    %106 = arith.mulf %104, %105 : vector<1x8x128xf32>
    %107 = arith.addf %103, %106 : vector<1x8x128xf32>
    %108 = vector.extract_strided_slice %96 {offsets = [1, 0, 0], sizes = [1, 8, 128], strides = [1, 1, 1]} : vector<2x8x128xf32> to vector<1x8x128xf32>
    %109 = vector.extract_strided_slice %96 {offsets = [1, 0, 0], sizes = [1, 8, 128], strides = [1, 1, 1]} : vector<2x8x128xf32> to vector<1x8x128xf32>
    %110 = arith.mulf %108, %109 : vector<1x8x128xf32>
    %111 = arith.addf %107, %110 : vector<1x8x128xf32>
    %112 = vector.extract_strided_slice %6 {offsets = [0, 0, 0], sizes = [1, 8, 128], strides = [1, 1, 1]} : vector<4x8x128xf32> to vector<1x8x128xf32>
    %113 = vector.extract_strided_slice %6 {offsets = [1, 0, 0], sizes = [1, 8, 128], strides = [1, 1, 1]} : vector<4x8x128xf32> to vector<1x8x128xf32>
    %114 = arith.maximumf %112, %113 : vector<1x8x128xf32>
    %115 = vector.extract_strided_slice %6 {offsets = [2, 0, 0], sizes = [1, 8, 128], strides = [1, 1, 1]} : vector<4x8x128xf32> to vector<1x8x128xf32>
    %116 = arith.maximumf %114, %115 : vector<1x8x128xf32>
    %117 = vector.extract_strided_slice %6 {offsets = [3, 0, 0], sizes = [1, 8, 128], strides = [1, 1, 1]} : vector<4x8x128xf32> to vector<1x8x128xf32>
    %118 = arith.maximumf %116, %117 : vector<1x8x128xf32>
    %119 = vector.extract_strided_slice %6 {offsets = [0, 0, 0], sizes = [1, 8, 128], strides = [1, 1, 1]} : vector<4x8x128xf32> to vector<1x8x128xf32>
    %120 = arith.subf %119, %118 : vector<1x8x128xf32>
    %121 = math.exp %120 : vector<1x8x128xf32>
    %122 = vector.extract_strided_slice %6 {offsets = [1, 0, 0], sizes = [1, 8, 128], strides = [1, 1, 1]} : vector<4x8x128xf32> to vector<1x8x128xf32>
    %123 = arith.subf %122, %118 : vector<1x8x128xf32>
    %124 = math.exp %123 : vector<1x8x128xf32>
    %125 = arith.addf %121, %124 : vector<1x8x128xf32>
    %126 = vector.extract_strided_slice %6 {offsets = [2, 0, 0], sizes = [1, 8, 128], strides = [1, 1, 1]} : vector<4x8x128xf32> to vector<1x8x128xf32>
    %127 = arith.subf %126, %118 : vector<1x8x128xf32>
    %128 = math.exp %127 : vector<1x8x128xf32>
    %129 = arith.addf %125, %128 : vector<1x8x128xf32>
    %130 = vector.extract_strided_slice %6 {offsets = [3, 0, 0], sizes = [1, 8, 128], strides = [1, 1, 1]} : vector<4x8x128xf32> to vector<1x8x128xf32>
    %131 = arith.subf %130, %118 : vector<1x8x128xf32>
    %132 = math.exp %131 : vector<1x8x128xf32>
    %133 = arith.addf %129, %132 : vector<1x8x128xf32>
    %134 = math.log %133 : vector<1x8x128xf32>
    %135 = arith.addf %118, %134 : vector<1x8x128xf32>
    %cst_34 = arith.constant 0.000000e+00 : f32
    %136 = vector.broadcast %cst_34 : f32 to vector<1x8x128xf32>
    %137 = arith.cmpf oeq, %10, %136 : vector<1x8x128xf32>
    %138 = vector.extract_strided_slice %6 {offsets = [0, 0, 0], sizes = [1, 8, 128], strides = [1, 1, 1]} : vector<4x8x128xf32> to vector<1x8x128xf32>
    %cst_35 = arith.constant 0.000000e+00 : f32
    %139 = vector.broadcast %cst_35 : f32 to vector<1x8x128xf32>
    %140 = arith.select %137, %138, %139 : vector<1x8x128xi1>, vector<1x8x128xf32>
    %cst_36 = arith.constant 1.000000e+00 : f32
    %141 = vector.broadcast %cst_36 : f32 to vector<1x8x128xf32>
    %142 = arith.cmpf oeq, %10, %141 : vector<1x8x128xf32>
    %143 = vector.extract_strided_slice %6 {offsets = [1, 0, 0], sizes = [1, 8, 128], strides = [1, 1, 1]} : vector<4x8x128xf32> to vector<1x8x128xf32>
    %cst_37 = arith.constant 0.000000e+00 : f32
    %144 = vector.broadcast %cst_37 : f32 to vector<1x8x128xf32>
    %145 = arith.select %142, %143, %144 : vector<1x8x128xi1>, vector<1x8x128xf32>
    %146 = arith.addf %140, %145 : vector<1x8x128xf32>
    %cst_38 = arith.constant 2.000000e+00 : f32
    %147 = vector.broadcast %cst_38 : f32 to vector<1x8x128xf32>
    %148 = arith.cmpf oeq, %10, %147 : vector<1x8x128xf32>
    %149 = vector.extract_strided_slice %6 {offsets = [2, 0, 0], sizes = [1, 8, 128], strides = [1, 1, 1]} : vector<4x8x128xf32> to vector<1x8x128xf32>
    %cst_39 = arith.constant 0.000000e+00 : f32
    %150 = vector.broadcast %cst_39 : f32 to vector<1x8x128xf32>
    %151 = arith.select %148, %149, %150 : vector<1x8x128xi1>, vector<1x8x128xf32>
    %152 = arith.addf %146, %151 : vector<1x8x128xf32>
    %cst_40 = arith.constant 3.000000e+00 : f32
    %153 = vector.broadcast %cst_40 : f32 to vector<1x8x128xf32>
    %154 = arith.cmpf oeq, %10, %153 : vector<1x8x128xf32>
    %155 = vector.extract_strided_slice %6 {offsets = [3, 0, 0], sizes = [1, 8, 128], strides = [1, 1, 1]} : vector<4x8x128xf32> to vector<1x8x128xf32>
    %cst_41 = arith.constant 0.000000e+00 : f32
    %156 = vector.broadcast %cst_41 : f32 to vector<1x8x128xf32>
    %157 = arith.select %154, %155, %156 : vector<1x8x128xi1>, vector<1x8x128xf32>
    %158 = arith.addf %152, %157 : vector<1x8x128xf32>
    %159 = arith.subf %135, %158 : vector<1x8x128xf32>
    %cst_42 = arith.constant 2.500000e+00 : f32
    %160 = vector.broadcast %cst_42 : f32 to vector<1x8x128xf32>
    %161 = arith.mulf %160, %111 : vector<1x8x128xf32>
    %162 = arith.addf %161, %91 : vector<1x8x128xf32>
    %163 = arith.addf %162, %159 : vector<1x8x128xf32>
    %c0_43 = arith.constant 0 : index
    %c0_44 = arith.constant 0 : index
    %c0_45 = arith.constant 0 : index
    %164 = vector.load %arg4[%c0_43, %c0_44, %c0_45] : memref<1x8x128xf32, #tpu.memory_space<vmem>>, vector<1x8x128xf32>
    %cst_46 = arith.constant 0.000000e+00 : f32
    %165 = vector.broadcast %cst_46 : f32 to vector<1x8x128xf32>
    %166 = arith.select %25, %163, %165 : vector<1x8x128xi1>, vector<1x8x128xf32>
    %167 = arith.addf %164, %166 : vector<1x8x128xf32>
    %c0_47 = arith.constant 0 : index
    %c0_48 = arith.constant 0 : index
    %c0_49 = arith.constant 0 : index
    %168 = vector.load %arg4[%c0_47, %c0_48, %c0_49] : memref<1x8x128xf32, #tpu.memory_space<vmem>>, vector<1x8x128xf32>
    tpu.vector_store %arg4[%c0_47, %c0_48, %c0_49], %167 {strides = array<i32>} : memref<1x8x128xf32, #tpu.memory_space<vmem>>, vector<1x8x128xf32>,
    %c0_50 = arith.constant 0 : index
    %c0_51 = arith.constant 0 : index
    %c0_52 = arith.constant 0 : index
    %169 = vector.load %arg5[%c0_50, %c0_51, %c0_52] : memref<1x8x128xf32, #tpu.memory_space<vmem>>, vector<1x8x128xf32>
    %170 = arith.extui %25 : vector<1x8x128xi1> to vector<1x8x128xi32>
    %171 = arith.sitofp %170 : vector<1x8x128xi32> to vector<1x8x128xf32>
    %172 = arith.addf %169, %171 : vector<1x8x128xf32>
    %c0_53 = arith.constant 0 : index
    %c0_54 = arith.constant 0 : index
    %c0_55 = arith.constant 0 : index
    %173 = vector.load %arg5[%c0_53, %c0_54, %c0_55] : memref<1x8x128xf32, #tpu.memory_space<vmem>>, vector<1x8x128xf32>
    tpu.vector_store %arg5[%c0_53, %c0_54, %c0_55], %172 {strides = array<i32>} : memref<1x8x128xf32, #tpu.memory_space<vmem>>, vector<1x8x128xf32>,
    %c0_56 = arith.constant 0 : index
    %c0_57 = arith.constant 0 : index
    %c0_58 = arith.constant 0 : index
    %174 = vector.load %arg6[%c0_56, %c0_57, %c0_58] : memref<1x8x128xf32, #tpu.memory_space<vmem>>, vector<1x8x128xf32>
    %cst_59 = arith.constant 0.000000e+00 : f32
    %175 = vector.broadcast %cst_59 : f32 to vector<1x8x128xf32>
    %176 = arith.select %28, %40, %175 : vector<1x8x128xi1>, vector<1x8x128xf32>
    %177 = arith.addf %174, %176 : vector<1x8x128xf32>
    %c0_60 = arith.constant 0 : index
    %c0_61 = arith.constant 0 : index
    %c0_62 = arith.constant 0 : index
    %178 = vector.load %arg6[%c0_60, %c0_61, %c0_62] : memref<1x8x128xf32, #tpu.memory_space<vmem>>, vector<1x8x128xf32>
    tpu.vector_store %arg6[%c0_60, %c0_61, %c0_62], %177 {strides = array<i32>} : memref<1x8x128xf32, #tpu.memory_space<vmem>>, vector<1x8x128xf32>,
    %c0_63 = arith.constant 0 : index
    %c0_64 = arith.constant 0 : index
    %c0_65 = arith.constant 0 : index
    %179 = vector.load %arg7[%c0_63, %c0_64, %c0_65] : memref<1x8x128xf32, #tpu.memory_space<vmem>>, vector<1x8x128xf32>
    %180 = arith.extui %28 : vector<1x8x128xi1> to vector<1x8x128xi32>
    %181 = arith.sitofp %180 : vector<1x8x128xi32> to vector<1x8x128xf32>
    %182 = arith.addf %179, %181 : vector<1x8x128xf32>
    %c0_66 = arith.constant 0 : index
    %c0_67 = arith.constant 0 : index
    %c0_68 = arith.constant 0 : index
    %183 = vector.load %arg7[%c0_66, %c0_67, %c0_68] : memref<1x8x128xf32, #tpu.memory_space<vmem>>, vector<1x8x128xf32>
    tpu.vector_store %arg7[%c0_66, %c0_67, %c0_68], %182 {strides = array<i32>} : memref<1x8x128xf32, #tpu.memory_space<vmem>>, vector<1x8x128xf32>,
    %c0_i32_69 = arith.constant 0 : i32
    %184 = arith.cmpi eq, %arg1, %c0_i32_69 : i32
    %185 = arith.extui %184 : i1 to i32
    %c0_i32_70 = arith.constant 0 : i32
    %186 = arith.cmpi ne, %185, %c0_i32_70 : i32
    scf.if %186 {
      %c0_71 = arith.constant 0 : index
      %c0_72 = arith.constant 0 : index
      %c0_73 = arith.constant 0 : index
      %187 = vector.load %arg4[%c0_71, %c0_72, %c0_73] : memref<1x8x128xf32, #tpu.memory_space<vmem>>, vector<1x8x128xf32>
      %188 = vector.shape_cast %187 : vector<1x8x128xf32> to vector<1x1x8x128xf32>
      %cst_74 = arith.constant dense<0.000000e+00> : vector<1xf32>
      %189 = vector.multi_reduction <add>, %188, %cst_74 [1, 2, 3] : vector<1x1x8x128xf32> to vector<1xf32>
      %190 = vector.shape_cast %189 : vector<1xf32> to vector<1x1x1x1xf32>
      %191 = vector.extract %190[0, 0, 0, 0] : f32 from vector<1x1x1x1xf32>
      %c0_75 = arith.constant 0 : index
      %c0_76 = arith.constant 0 : index
      %c0_77 = arith.constant 0 : index
      %192 = vector.load %arg5[%c0_75, %c0_76, %c0_77] : memref<1x8x128xf32, #tpu.memory_space<vmem>>, vector<1x8x128xf32>
      %193 = vector.shape_cast %192 : vector<1x8x128xf32> to vector<1x1x8x128xf32>
      %cst_78 = arith.constant dense<0.000000e+00> : vector<1xf32>
      %194 = vector.multi_reduction <add>, %193, %cst_78 [1, 2, 3] : vector<1x1x8x128xf32> to vector<1xf32>
      %195 = vector.shape_cast %194 : vector<1xf32> to vector<1x1x1x1xf32>
      %196 = vector.extract %195[0, 0, 0, 0] : f32 from vector<1x1x1x1xf32>
      %c0_79 = arith.constant 0 : index
      %c0_80 = arith.constant 0 : index
      %c0_81 = arith.constant 0 : index
      %197 = vector.load %arg6[%c0_79, %c0_80, %c0_81] : memref<1x8x128xf32, #tpu.memory_space<vmem>>, vector<1x8x128xf32>
      %198 = vector.shape_cast %197 : vector<1x8x128xf32> to vector<1x1x8x128xf32>
      %cst_82 = arith.constant dense<0.000000e+00> : vector<1xf32>
      %199 = vector.multi_reduction <add>, %198, %cst_82 [1, 2, 3] : vector<1x1x8x128xf32> to vector<1xf32>
      %200 = vector.shape_cast %199 : vector<1xf32> to vector<1x1x1x1xf32>
      %201 = vector.extract %200[0, 0, 0, 0] : f32 from vector<1x1x1x1xf32>
      %c0_83 = arith.constant 0 : index
      %c0_84 = arith.constant 0 : index
      %c0_85 = arith.constant 0 : index
      %202 = vector.load %arg7[%c0_83, %c0_84, %c0_85] : memref<1x8x128xf32, #tpu.memory_space<vmem>>, vector<1x8x128xf32>
      %203 = vector.shape_cast %202 : vector<1x8x128xf32> to vector<1x1x8x128xf32>
      %cst_86 = arith.constant dense<0.000000e+00> : vector<1xf32>
      %204 = vector.multi_reduction <add>, %203, %cst_86 [1, 2, 3] : vector<1x1x8x128xf32> to vector<1xf32>
      %205 = vector.shape_cast %204 : vector<1xf32> to vector<1x1x1x1xf32>
      %206 = vector.extract %205[0, 0, 0, 0] : f32 from vector<1x1x1x1xf32>
      %207 = tpu.iota {dimensions = array<i32: 1>} : vector<1x128xi32>
      %c0_i32_87 = arith.constant 0 : i32
      %208 = vector.broadcast %c0_i32_87 : i32 to vector<1x128xi32>
      %209 = arith.cmpi eq, %207, %208 : vector<1x128xi32>
      %cst_88 = arith.constant 0.000000e+00 : f32
      %210 = vector.broadcast %191 : f32 to vector<1x128xf32>
      %211 = vector.broadcast %cst_88 : f32 to vector<1x128xf32>
      %212 = arith.select %209, %210, %211 : vector<1x128xi1>, vector<1x128xf32>
      %c1_i32_89 = arith.constant 1 : i32
      %213 = vector.broadcast %c1_i32_89 : i32 to vector<1x128xi32>
      %214 = arith.cmpi eq, %207, %213 : vector<1x128xi32>
      %cst_90 = arith.constant 0.000000e+00 : f32
      %215 = vector.broadcast %196 : f32 to vector<1x128xf32>
      %216 = vector.broadcast %cst_90 : f32 to vector<1x128xf32>
      %217 = arith.select %214, %215, %216 : vector<1x128xi1>, vector<1x128xf32>
      %218 = arith.addf %212, %217 : vector<1x128xf32>
      %c2_i32 = arith.constant 2 : i32
      %219 = vector.broadcast %c2_i32 : i32 to vector<1x128xi32>
      %220 = arith.cmpi eq, %207, %219 : vector<1x128xi32>
      %cst_91 = arith.constant 0.000000e+00 : f32
      %221 = vector.broadcast %201 : f32 to vector<1x128xf32>
      %222 = vector.broadcast %cst_91 : f32 to vector<1x128xf32>
      %223 = arith.select %220, %221, %222 : vector<1x128xi1>, vector<1x128xf32>
      %224 = arith.addf %218, %223 : vector<1x128xf32>
      %c3_i32 = arith.constant 3 : i32
      %225 = vector.broadcast %c3_i32 : i32 to vector<1x128xi32>
      %226 = arith.cmpi eq, %207, %225 : vector<1x128xi32>
      %cst_92 = arith.constant 0.000000e+00 : f32
      %227 = vector.broadcast %206 : f32 to vector<1x128xf32>
      %228 = vector.broadcast %cst_92 : f32 to vector<1x128xf32>
      %229 = arith.select %226, %227, %228 : vector<1x128xi1>, vector<1x128xf32>
      %230 = arith.addf %224, %229 : vector<1x128xf32>
      %c0_93 = arith.constant 0 : index
      %c0_94 = arith.constant 0 : index
      %231 = vector.load %arg3[%c0_93, %c0_94] : memref<1x128xf32, #tpu.memory_space<vmem>>, vector<1x128xf32>
      tpu.vector_store %arg3[%c0_93, %c0_94], %230 {strides = array<i32>} : memref<1x128xf32, #tpu.memory_space<vmem>>, vector<1x128xf32>,
    } else {
    }
    return
  }
  func.func @transform_0(%arg0: i32, %arg1: i32) -> (i32, i32, i32) {
    %c1_i32 = arith.constant 1 : i32
    %0 = arith.muli %arg0, %c1_i32 : i32
    %1 = arith.addi %0, %arg1 : i32
    %c0_i32 = arith.constant 0 : i32
    %c0_i32_0 = arith.constant 0 : i32
    %c0_i32_1 = arith.constant 0 : i32
    return %c0_i32, %1, %c0_i32_0 : i32, i32, i32
  }
  func.func @transform_1(%arg0: i32, %arg1: i32) -> (i32, i32) {
    %c0_i32 = arith.constant 0 : i32
    %c0_i32_0 = arith.constant 0 : i32
    return %c0_i32, %arg0 : i32, i32
  }
}

</mosaic_0001>

<bundles_post_ra>
// kernel: yolo_loss_pallas.1
= control target key start
LH: loop header
LB: loop body
LE: loop exit
PB: predicated region body
PF: predicated region fallthrough
CT: control target
= control target key end

     0   :  { %s524_s6 = smov 0   ;;  %s651_s0 = inlined_call_operand.vmem [shape: f32[15,3,128], index: 0, kind: input, shape index: {}]   ;;  %s652_s1 = inlined_call_operand.vmem [shape: f32[1,128], index: 1, kind: output, shape index: {}]  }
   0x1 LB: > { %v32_v0 = vld [vmem:[%s651_s0] sm:$0xf]  ;;  %v34_v1 = vld [vmem:[%s651_s0 + $0x4] sm:$0xf]  ;;  %v36_v2 = vld [vmem:[%s651_s0 + $0x8] sm:$0xf]  ;;  %s511_s6 = sphi %s524_s6, %s26_s6  }
   0x2   : > { %33 = vst [vmem:[#allocation6] sm:$0xf] %v32_v0  ;;  %35 = vst [vmem:[#allocation6 + $0x8] sm:$0xf] %v34_v1  ;;  %v38_v3 = vld [vmem:[%s651_s0 + $0xc] sm:$0xf] }
   0x3   : > { %37 = vst [vmem:[#allocation6 + $0x10] sm:$0xf] %v36_v2  ;;  %v40_v4 = vld [vmem:[%s651_s0 + $0x10] sm:$0xf]  ;;  %v42_v5 = vld [vmem:[%s651_s0 + $0x14] sm:$0xf] }
   0x4   : > { %39 = vst [vmem:[#allocation6 + $0x18] sm:$0xf] %v38_v3  ;;  %41 = vst [vmem:[#allocation6 + $0x20] sm:$0xf] %v40_v4  ;;  %v44_v6 = vld [vmem:[%s651_s0 + $0x18] sm:$0xf] }
   0x5   : > { %43 = vst [vmem:[#allocation6 + $0x28] sm:$0xf] %v42_v5  ;;  %v46_v7 = vld [vmem:[%s651_s0 + $0x1c] sm:$0xf]  ;;  %v48_v8 = vld [vmem:[%s651_s0 + $0x20] sm:$0xf] }
   0x6   : > { %45 = vst [vmem:[#allocation6 + $0x30] sm:$0xf] %v44_v6  ;;  %47 = vst [vmem:[#allocation6 + $0x38] sm:$0xf] %v46_v7  ;;  %v50_v9 = vld [vmem:[%s651_s0 + $0x24] sm:$0xf] }
   0x7   : > { %49 = vst [vmem:[#allocation6 + $0x40] sm:$0xf] %v48_v8  ;;  %v52_v10 = vld [vmem:[%s651_s0 + $0x28] sm:$0xf]  ;;  %v54_v11 = vld [vmem:[%s651_s0 + $0x2c] sm:$0xf] }
   0x8   : > { %51 = vst [vmem:[#allocation6 + $0x48] sm:$0xf] %v50_v9  ;;  %53 = vst [vmem:[#allocation6 + $0x50] sm:$0xf] %v52_v10  ;;  %v56_v12 = vld [vmem:[%s651_s0 + $0x30] sm:$0xf] }
   0x9   : > { %55 = vst [vmem:[#allocation6 + $0x58] sm:$0xf] %v54_v11  ;;  %v58_v13 = vld [vmem:[%s651_s0 + $0x34] sm:$0xf]  ;;  %v60_v14 = vld [vmem:[%s651_s0 + $0x38] sm:$0xf] }
   0xa   : > { %57 = vst [vmem:[#allocation6 + $0x60] sm:$0xf] %v56_v12  ;;  %59 = vst [vmem:[#allocation6 + $0x68] sm:$0xf] %v58_v13  ;;  %s26_s6 = sadd.s32 1, %s511_s6  }
   0xb   : > { %61 = vst [vmem:[#allocation6 + $0x70] sm:$0xf] %v60_v14  ;;  %p25_p0 = scmp.ge.s32.totalorder %s26_s6, 1 }
   0xc   :  { %v577_v15 = vld [vmem:[#allocation6] sm:$0xff] (%p25_p0)  ;;  %v151_v16 = vld [vmem:[#allocation6 + $0x8] sm:$0xff] (%p25_p0)  ;;  %v152_v18 = vld [vmem:[#allocation6 + $0x10] sm:$0xff] (%p25_p0)  ;;  %v173_v36 = vlaneseq (%p25_p0) }
   0xd   :  { %28 = sbr.rel (!%p25_p0) target bundleno = 1 (0x1), region = 87  ;;  %v189_v17 = vand.u32 (%p25_p0), 2147483647, %v577_v15  ;;  %v580_v20 = vld [vmem:[#allocation6 + $0x28] sm:$0xff] (%p25_p0)  ;;  %v582_v21 = vld [vmem:[#allocation6 + $0x30] sm:$0xff] (%p25_p0)  ;;  %v197_v22 = vsub.f32 (%p25_p0), 0.0, %v151_v16 }
   0xe   :  { %v198_v24 = vsub.f32 (%p25_p0), 0.0, %v152_v18  ;;  %v269_v26 = vmax.f32 (%p25_p0), %v580_v20, %v582_v21  ;;  %v586_v27 = vld [vmem:[#allocation6 + $0x38] sm:$0xff] (%p25_p0)  ;;  %v590_v30 = vld [vmem:[#allocation6 + $0x20] sm:$0xff] (%p25_p0)  ;;  %v174_v42 = vshrl.u32 (%p25_p0), %v173_v36, 7  ;;  %v608_v51 = vand.u32 (%p25_p0), 127, %v173_v36 }
   0xf   :  { %v190_v19 = vsub.f32 (%p25_p0), 0.0, %v189_v17  ;;  %v199_v25 = vmul.f32 (%p25_p0), 1.442695, %v197_v22  ;;  %v588_v29 = vld [vmem:[#allocation6 + $0x18] sm:$0xff] (%p25_p0)  ;;  %v592_v31 = vld [vmem:[#allocation6 + $0x40] sm:$0xff] (%p25_p0)  ;;  %v610_v54 = vld [vmem:[#allocation6 + $0x48] sm:$0xff] (%p25_p0) }
  0x10   :  { %v201_v28 = vmul.f32 (%p25_p0), 1.442695, %v198_v24  ;;  %v270_v32 = vmax.f32 (%p25_p0), %v269_v26, %v586_v27  ;;  %v209_v33 = vmul.f32 (%p25_p0), 1.442695, %v588_v29  ;;  %v211_v34 = vmul.f32 (%p25_p0), 1.442695, %v590_v30 }
  0x11   :  { %v191_v23 = vmul.f32 (%p25_p0), 1.442695, %v190_v19  ;;  %v179_v52 = vmul.u32 (%p25_p0), 128, %v174_v42  ;;  %v167_v55 = vld [vmem:[#allocation6 + $0x60] sm:$0xff] (%p25_p0)  ;;  %v186_v56 = vmax.f32 (%p25_p0), %v577_v15, 0.0  ;;  %v187_v57 = vmul.f32 (%p25_p0), %v610_v54, %v577_v15  ;;  %v168_v59 = vld [vmem:[#allocation6 + $0x68] sm:$0xff] (%p25_p0) }
  0x12   :  { %v598_v35 = vmax.f32 (%p25_p0), %v270_v32, %v592_v31  ;;  %v243_v58 = vsub.f32 (%p25_p0), 0.0, %v577_v15  ;;  %v254_v62 = vadd.f32 (%p25_p0), 1e-16, %v167_v55  ;;  %v219_v0 = vmul.f32 (%p25_p0), 0.5, %v167_v55  ;;  %v164_v1 = vld [vmem:[#allocation6 + $0x50] sm:$0xff] (%p25_p0)  ;;  %v165_v5 = vld [vmem:[#allocation6 + $0x58] sm:$0xff] (%p25_p0) }
  0x13   :  { %457 = vpow2.f32 (%p25_p0), %v191_v23  ;;  %v617_v61 = vadd.s32 (%p25_p0), %v179_v52, %v608_v51  ;;  %v220_v2 = vmul.f32 (%p25_p0), 0.5, %v168_v59  ;;  %vm184_vm0 = vcmp.eq.f32.partialorder (%p25_p0), %v610_v54, 0.0 }
  0x14   :  { %459 = vpow2.f32 %v199_v25  ;;  %v272_v37 = vsub.f32 %v580_v20, %v598_v35  ;;  %v275_v38 = vsub.f32 %v582_v21, %v598_v35  ;;  %v279_v40 = vsub.f32 %v586_v27, %v598_v35 }
  0x15   :  { %461 = vpow2.f32 %v201_v28  ;;  %v283_v45 = vsub.f32 %v592_v31, %v598_v35  ;;  %v188_v3 = vsub.f32 %v186_v56, %v187_v57  ;;  %v244_v4 = vmul.f32 1.442695, %v243_v58  ;;  %v170_v58 = vld [vmem:[#allocation6 + $0x70] sm:$0xff] }
  0x16   :  { %463 = vpow2.f32 %v209_v33  ;;  %v273_v39 = vmul.f32 1.442695, %v272_v37  ;;  %v276_v48 = vmul.f32 1.442695, %v275_v38  ;;  %v280_v50 = vmul.f32 1.442695, %v279_v40 }
  0x17   :  { %465 = vpow2.f32 %v211_v34  ;;  %v284_v53 = vmul.f32 1.442695, %v283_v45  ;;  %vm181_vm1 = vcmp.lt.s32.totalorder %v617_v61, 384  ;;  %v255_v9 = vadd.f32 1e-16, %v168_v59 }
  0x18   :  { %467 = vpow2.f32 %v273_v39  ;;  %v221_v11 = vsub.f32 %v164_v1, %v219_v0  ;;  %v223_v12 = vadd.f32 %v219_v0, %v164_v1  ;;  %v236_v13 = vmul.f32 %v168_v59, %v167_v55  ;;  %vm625_vm2 = vmand %vm184_vm0, %vm181_vm1 }
  0x19   :  { %v222_v16 = vsub.f32 %v165_v5, %v220_v2  ;;  %v224_v17 = vadd.f32 %v220_v2, %v165_v5  ;;  %vm290_vm3 = vcmp.eq.f32.partialorder %v170_v58, 0.0  ;;  %vm292_vm4 = vcmp.eq.f32.partialorder %v170_v58, 1.0 }
  0x1a   :  { %v237_v37 = vand.u32 2147483647, %v236_v13  ;;  %vm295_vm5 = vcmp.eq.f32.partialorder %v170_v58, 2.0  ;;  %vm298_vm6 = vcmp.eq.f32.partialorder %v170_v58, 3.0  ;;  %vm182_vm7 = vcmp.eq.f32.partialorder %v610_v54, 1.0 }
  0x1b   :  { %vm183_vm8 = vmand %vm182_vm7, %vm181_vm1  ;;  %vm366_vm9 = vcmp.eq.s32.totalorder %v608_v51, 0  ;;  %vm369_vm10 = vcmp.eq.s32.totalorder %v608_v51, 1  ;;  %vm373_vm11 = vcmp.eq.s32.totalorder %v608_v51, 2  ;;  %vm377_vm12 = vcmp.eq.s32.totalorder %v608_v51, 3 }
  0x1d   :  { %v458_v41 = vpop.eup %457 }
  0x1e   :  { %v460_v43 = vpop.eup %459  ;;  %v193_v44 = vadd.f32 1.0, %v458_v41 }
  0x1f   :  { %v462_v46 = vpop.eup %461  ;;  %v203_v47 = vadd.f32 1.0, %v460_v43 }
  0x20   :  { %469 = vlog2.f32 %v193_v44  ;;  %v204_v49 = vadd.f32 1.0, %v462_v46  ;;  %v464_v60 = vpop.eup %463 }
  0x21   :  { %471 = vrcp.f32 %v203_v47  ;;  %v466_v63 = vpop.eup %465  ;;  %v213_v6 = vmul.f32 0.5, %v464_v60  ;;  %v513_v47 = vmov 0.0  }
  0x22   :  { %473 = vrcp.f32 %v204_v49  ;;  %v468_v7 = vpop.eup %467  ;;  %v214_v8 = vmul.f32 0.5, %v466_v63  ;;  %v234_v18 = vmul.f32 %v466_v63, %v464_v60 }
  0x23   :  { %475 = vpow2.f32 %v276_v48  ;;  %v415_v48 = vsel %vm625_vm2, 1.0, %v513_v47 }
  0x24   :  { %477 = vpow2.f32 %v280_v50  ;;  %v235_v42 = vand.u32 2147483647, %v234_v18 }
  0x25   :  { %479 = vpow2.f32 %v284_v53 }
  0x26   :  { %481 = vlog2.f32 %v254_v62  ;;  %v238_v53 = vadd.f32 %v237_v37, %v235_v42 }
  0x27   :  { %483 = vpow2.f32 %v244_v4 }
  0x28   :  { %485 = vlog2.f32 %v255_v9  ;;  %v291_v9 = vsel %vm290_vm3, %v580_v20, 0.0 }
  0x2a   :  { %v470_v10 = vpop.eup %469 }
  0x2b   :  { %v472_v14 = vpop.eup %471  ;;  %v195_v15 = vmul.f32 0.6931472, %v470_v10 }
  0x2c   :  { %v474_v19 = vpop.eup %473  ;;  %v215_v23 = vsub.f32 %v472_v14, %v213_v6  ;;  %v217_v24 = vadd.f32 %v472_v14, %v213_v6  ;;  %v252_v59 = vsub.f32 %v472_v14, %v164_v1  ;;  %v293_v1 = vsel %vm292_vm4, %v582_v21, 0.0 }
  0x2d   :  { %v476_v25 = vpop.eup %475  ;;  %v196_v26 = vadd.f32 %v195_v15, %v188_v3  ;;  %v216_v28 = vsub.f32 %v474_v19, %v214_v8  ;;  %v218_v32 = vadd.f32 %v474_v19, %v214_v8  ;;  %v253_v60 = vsub.f32 %v474_v19, %v165_v5 }
  0x2e   :  { %v478_v33 = vpop.eup %477  ;;  %v225_v34 = vmin.f32 %v217_v24, %v223_v12  ;;  %v227_v36 = vmax.f32 %v215_v23, %v221_v11  ;;  %v278_v38 = vadd.f32 %v476_v25, %v468_v7  ;;  %v262_v7 = vmul.f32 %v252_v59, %v252_v59 }
  0x2f   :  { %v315_v39 = vsel %vm625_vm2, %v196_v26, 0.0  ;;  %v226_v40 = vmin.f32 %v218_v32, %v224_v17  ;;  %v228_v41 = vmax.f32 %v216_v28, %v222_v16  ;;  %v480_v43 = vpop.eup %479  ;;  %v263_v8 = vmul.f32 %v253_v60, %v253_v60 }
  0x30   :  { %347 = vadd.xlane.f32.xlu1 %v315_v39  ;;  %v229_v44 = vsub.f32 %v225_v34, %v227_v36  ;;  %v282_v45 = vadd.f32 %v478_v33, %v278_v38  ;;  %v482_v50 = vpop.eup %481  ;;  %v294_v12 = vadd.f32 %v293_v1, %v291_v9  ;;  %v296_v14 = vsel %vm295_vm5, %v586_v27, 0.0 }
  0x31   :  { %v230_v46 = vsub.f32 %v226_v40, %v228_v41  ;;  %v484_v57 = vpop.eup %483  ;;  %v257_v62 = vmul.f32 0.6931472, %v482_v50  ;;  %v264_v10 = vadd.f32 %v263_v8, %v262_v7  ;;  %v299_v19 = vsel %vm298_vm6, %v592_v31, 0.0 }
  0x32   :  { %v231_v49 = vmax.f32 %v229_v44, 0.0  ;;  %v286_v55 = vadd.f32 %v480_v43, %v282_v45  ;;  %v486_v63 = vpop.eup %485  ;;  %v246_v2 = vadd.f32 1.0, %v484_v57  ;;  %v297_v17 = vadd.f32 %v296_v14, %v294_v12 }
  0x33   :  { %v232_v52 = vmax.f32 %v230_v46, 0.0  ;;  %v259_v4 = vmul.f32 0.6931472, %v486_v63  ;;  %v260_v6 = vsub.f32 %v588_v29, %v257_v62  ;;  %v414_v34 = vsel %vm183_vm8, 1.0, %v513_v47 }
  0x34   :  { %357 = vadd.xlane.f32.xlu1 %v415_v48  ;;  %487 = vlog2.f32 %v286_v55  ;;  %v300_v24 = vadd.f32 %v299_v19, %v297_v17 }
  0x35   :  { %v233_v56 = vmul.f32 %v232_v52, %v231_v49  ;;  %v261_v5 = vsub.f32 %v590_v30, %v259_v4  ;;  %v265_v11 = vmul.f32 %v260_v6, %v260_v6 }
  0x37   :  { %v239_v0 = vsub.f32 %v238_v53, %v233_v56  ;;  %v266_v15 = vadd.f32 %v265_v11, %v264_v10  ;;  %v267_v16 = vmul.f32 %v261_v5, %v261_v5 }
  0x39   :  { %v240_v3 = vadd.f32 1e-06, %v239_v0  ;;  %v268_v22 = vadd.f32 %v267_v16, %v266_v15 }
  0x3b   :  { %489 = vrcp.f32 %v240_v3  ;;  %v302_v26 = vmul.f32 2.5, %v268_v22 }
  0x3c   :  { %491 = vrcp.f32 %v246_v2 }
  0x3e   :  { %v488_v13 = vpop.eup %487 }
  0x3f   :  { %v288_v29 = vmul.f32 0.6931472, %v488_v13 }
  0x41   :  { %v289_v23 = vadd.f32 %v288_v29, %v598_v35 }
  0x43   :  { %v301_v28 = vsub.f32 %v289_v23, %v300_v24 }
  0x45   :  { %v490_v18 = vpop.eup %489 }
  0x46   :  { %v242_v20 = vmul.f32 %v490_v18, %v233_v56  ;;  %v492_v21 = vpop.eup %491 }
  0x48   :  { %v249_v30 = vmul.f32 %v242_v20, %v610_v54 }
  0x4a   :  { %v250_v25 = vsub.f32 %v492_v21, %v249_v30 }
  0x4c   :  { %v251_v27 = vmul.f32 %v250_v25, %v250_v25 }
  0x4e   :  { %v303_v32 = vadd.f32 %v302_v26, %v251_v27 }
  0x50   :  { %v304_v33 = vadd.f32 %v303_v32, %v301_v28 }
  0x52   :  { %v306_v31 = vsel %vm183_vm8, %v304_v33, 0.0 }
  0x53   :  { %327 = vadd.xlane.f32.xlu0 %v306_v31 }
  0x57   :  { %337 = vadd.xlane.f32.xlu0 %v414_v34 }
  0xbd   :  { %v348_v36 = vpop.xlane.xlu1 %347 }
  0xbe   :  { %v349_v38 = vrot.slane %v348_v36, 4 }
  0xc0   :  { %v350_v39 = vadd.f32 %v349_v38, %v348_v36 }
  0xc1   :  { %v358_v37 = vpop.xlane.xlu1 %357 }
  0xc2   :  { %v359_v35 = vrot.slane %v358_v37, 4  ;;  %v351_v43 = vrot.slane %v350_v39, 2 }
  0xc4   :  { %v360_v42 = vadd.f32 %v359_v35, %v358_v37  ;;  %v352_v50 = vadd.f32 %v351_v43, %v350_v39 }
  0xc6   :  { %v361_v46 = vrot.slane %v360_v42, 2  ;;  %v353_v57 = vrot.slane %v352_v50, 1 }
  0xc8   :  { %v362_v52 = vadd.f32 %v361_v46, %v360_v42  ;;  %v354_v62 = vadd.f32 %v353_v57, %v352_v50 }
  0xca   :  { %v363_v59 = vrot.slane %v362_v52, 1 }
  0xcc   :  { %v364_v63 = vadd.f32 %v363_v59, %v362_v52 }
  0xe0   :  { %v328_v40 = vpop.xlane.xlu0 %327 }
  0xe1   :  { %v329_v41 = vrot.slane %v328_v40, 4 }
  0xe3   :  { %v330_v54 = vadd.f32 %v329_v41, %v328_v40 }
  0xe4   :  { %v338_v44 = vpop.xlane.xlu0 %337 }
  0xe5   :  { %v331_v45 = vrot.slane %v330_v54, 2  ;;  %v339_v61 = vrot.slane %v338_v44, 4 }
  0xe7   :  { %v340_v48 = vadd.f32 %v339_v61, %v338_v44  ;;  %v332_v49 = vadd.f32 %v331_v45, %v330_v54 }
  0xe9   :  { %v341_v47 = vrot.slane %v340_v48, 2  ;;  %v333_v53 = vrot.slane %v332_v49, 1 }
  0xeb   :  { %v342_v55 = vadd.f32 %v341_v47, %v340_v48  ;;  %v334_v56 = vadd.f32 %v333_v53, %v332_v49 }
  0xed   :  { %416 = vpush %v334_v56  ;;  %v343_v58 = vrot.slane %v342_v55, 1 }
  0xef   :  { %v344_v60 = vadd.f32 %v343_v58, %v342_v55 }
  0xf1   :  { %418 = vpush %v344_v60 }
  0xf2   :  { %420 = vpush %v354_v62 }
  0xf3   :  { %422 = vpush %v364_v63 }
 0x11e   :  { %s417_s0 = spop %416 }
 0x11f   :  { %v367_v0 = vstv %s417_s0 }
 0x120   :  { %v368_v3 = vsel %vm366_vm9, %v367_v0, 0.0 }
 0x122   :  { %s419_s6 = spop %418 }
 0x123   :  { %v370_v2 = vstv %s419_s6  ;;  %s421_s9 = spop %420 }
 0x124   :  { %v371_v4 = vsel %vm369_vm10, %v370_v2, 0.0  ;;  %v374_v6 = vstv %s421_s9  ;;  %s423_s10 = spop %422 }
 0x125   :  { %v372_v7 = vadd.f32 %v371_v4, %v368_v3  ;;  %v378_v8 = vstv %s423_s10  ;;  %v375_v9 = vsel %vm373_vm11, %v374_v6, 0.0 }
 0x126   :  { %v379_v5 = vsel %vm377_vm12, %v378_v8, 0.0 }
 0x127   :  { %v376_v1 = vadd.f32 %v375_v9, %v372_v7 }
 0x129   :  { %v380_v10 = vadd.f32 %v379_v5, %v376_v1 }
 0x12b   :  { %381 = vst [vmem:[%s652_s1] sm:$0x1] %v380_v10 }

</bundles_post_ra>
